<compile_context>
chip_gen: v6e
topology: v6e:2x2x1
jax: 0.10.0
libtpu: 0.0.40
codegen_flags: <defaults>
</compile_context>

<pallas_src>
import numpy as np
import jax
import jax.numpy as jnp
from jax.experimental import pallas as pl
from jax.experimental.pallas import tpu as pltpu


def _round_up(x, m):
    return ((x + m - 1) // m) * m


def _tile_config():
    """(TM, TN, TK, vmem_limit_bytes) chosen per TPU generation."""
    kind = ""
    try:
        kind = jax.devices()[0].device_kind.lower()
    except Exception:
        pass
    if "v6" in kind or "trillium" in kind:
        # v6e: 128 MiB VMEM -> larger tiles, raised scoped-VMEM limit.
        return 512, 128, 512, 64 * 1024 * 1024
    if "v7" in kind or "7x" in kind:
        # v7x: 64 MiB physical / 32 MiB scoped VMEM, 2 TCs -> keep tiles modest,
        # rely on parallel grid axes for megacore sharding.
        return 256, 128, 512, 32 * 1024 * 1024
    if "v5" in kind and ("lite" in kind or "v5e" in kind):
        # v5e: smallest tiles, tn=128 matches the 128-wide MXU.
        return 256, 128, 256, 32 * 1024 * 1024
    return 256, 128, 256, 32 * 1024 * 1024  # safe default


_TM, _TN, _TK, _VMEM_LIMIT = _tile_config()


def _k_tiling(k_raw):
    """Pad K to a multiple of 128 and pick a tile tk (multiple of 128,
    <= _TK) that divides the padded K exactly."""
    k_pad = _round_up(k_raw, 128)
    tk = 128
    t = 256
    while t <= min(_TK, k_pad):
        if k_pad % t == 0:
            tk = t
        t += 128
    return k_pad, tk


# ---------------------------------------------------------------------------
# Pallas kernel: tiled matmul + bias + ReLU (BN scale pre-folded into weights)
# ---------------------------------------------------------------------------
def _matmul_bias_relu_kernel(x_ref, w_ref, b_ref, o_ref, acc_ref):
    @pl.when(pl.program_id(2) == 0)
    def _():
        acc_ref[...] = jnp.zeros_like(acc_ref)

    # bf16 operands on the MXU, f32 accumulation.
    acc_ref[...] += jnp.dot(x_ref[...], w_ref[...],
                            preferred_element_type=jnp.float32)

    @pl.when(pl.program_id(2) == pl.num_programs(2) - 1)
    def _():
        y = acc_ref[...] + b_ref[...]              # f32 epilogue (v5e-safe)
        o_ref[...] = jnp.maximum(y, 0.0).astype(o_ref.dtype)


def _fused_matmul_bias_relu(x_mat, w_mat, bias_row, out_dtype):
    """relu(x_mat @ w_mat + bias_row).

    x_mat:   (M, K_pad)        bf16
    w_mat:   (K_pad, Cout_pad) bf16   (BN scale folded in, zero padded)
    bias_row:(1, Cout_pad)     f32
    returns: (M, Cout_pad)     out_dtype
    """
    m, k = x_mat.shape
    k_w, n_pad = w_mat.shape
    assert k == k_w and n_pad % 128 == 0 and k % 128 == 0

    tm = min(_TM, _round_up(m, 16))
    tn = min(_TN, n_pad)
    _, tk = _k_tiling(k)

    m_pad = _round_up(m, tm)
    if m_pad != m:
        x_mat = jnp.pad(x_mat, ((0, m_pad - m), (0, 0)))

    grid = (m_pad // tm, n_pad // tn, k // tk)

    flops = 2 * m_pad * k * n_pad
    bytes_accessed = (x_mat.size * x_mat.dtype.itemsize
                      + w_mat.size * w_mat.dtype.itemsize
                      + bias_row.size * bias_row.dtype.itemsize
                      + m_pad * n_pad * jnp.dtype(out_dtype).itemsize)

    out = pl.pallas_call(
        _matmul_bias_relu_kernel,
        out_shape=jax.ShapeDtypeStruct((m_pad, n_pad), out_dtype),
        grid_spec=pltpu.PrefetchScalarGridSpec(
            num_scalar_prefetch=0,
            grid=grid,
            in_specs=[
                pl.BlockSpec((tm, tk), lambda i, j, kk: (i, kk)),
                pl.BlockSpec((tk, tn), lambda i, j, kk: (kk, j)),
                pl.BlockSpec((1, tn), lambda i, j, kk: (0, j)),
            ],
            out_specs=pl.BlockSpec((tm, tn), lambda i, j, kk: (i, j)),
            scratch_shapes=[pltpu.VMEM((tm, tn), jnp.float32)],
        ),
        compiler_params=pltpu.CompilerParams(
            dimension_semantics=("parallel", "parallel", "arbitrary"),
            vmem_limit_bytes=_VMEM_LIMIT,
        ),
        cost_estimate=pl.CostEstimate(
            flops=flops, transcendentals=0, bytes_accessed=bytes_accessed),
    )(x_mat, w_mat, bias_row)

    return out[:m]


# ---------------------------------------------------------------------------
# One Conv3x3 + (folded) BN + ReLU layer
# ---------------------------------------------------------------------------
def conv3x3_bn_relu(x_nhwc, w_mat, bias_row, stride, cout):
    """x_nhwc: (N,H,W,Cin) f32; w_mat: (K_pad,Cout_pad) bf16; bias_row: (1,Cout_pad) f32."""
    n, h, w, cin = x_nhwc.shape
    ho = (h + 2 - 3) // stride + 1
    wo = (w + 2 - 3) // stride + 1
    k_raw = 9 * cin
    k_pad, _ = _k_tiling(k_raw)
    assert w_mat.shape[0] == k_pad

    # ---- glue (plain JAX): bf16 cast + zero-pad + im2col patch extraction ----
    # TODO(synk): move the 9-tap im2col into the kernel (halo tile / tap grid
    # axis) to avoid materializing the 9x-inflated patch matrix in HBM; the
    # strided (stride=2) overlapping halo windows are not expressible with
    # plain Blocked BlockSpecs, so the patch matrix is still built here (in
    # bf16 to halve its HBM traffic).
    xb = x_nhwc.astype(jnp.bfloat16)
    xp = jnp.pad(xb, ((0, 0), (1, 1), (1, 1), (0, 0)))
    taps = []
    for dy in range(3):
        for dx in range(3):
            taps.append(xp[:, dy:dy + stride * (ho - 1) + 1:stride,
                              dx:dx + stride * (wo - 1) + 1:stride, :])
    patches = jnp.stack(taps, axis=3)                  # (N, Ho, Wo, 9, Cin)
    m = n * ho * wo
    x_mat = patches.reshape(m, k_raw)
    if k_pad != k_raw:
        x_mat = jnp.pad(x_mat, ((0, 0), (0, k_pad - k_raw)))

    # ---- hot path: tiled Pallas matmul + bias + ReLU ----
    out = _fused_matmul_bias_relu(x_mat, w_mat, bias_row, jnp.float32)
    out = out[:, :cout]                                # drop lane padding
    return out.reshape(n, ho, wo, cout)


# ---------------------------------------------------------------------------
# Parameter init (mirrors the PyTorch module) + kernel-ready packing
# ---------------------------------------------------------------------------
def init_backbone_params(key, in_channel, out_channels, layer_nums,
                         layer_strides, eps=1e-3):
    """Returns:
       weights: nested list [[(w_mat_bf16, bias_row_f32), ...], ...]  (pytree)
       meta:    nested list [[(stride, cin, cout), ...], ...]         (static)
       raw:     nested list of dicts for the pure-JAX reference.
    Conv weights: kaiming-normal (fan_out, relu). BN: default eval-mode params
    folded into scale/bias, with scale folded into the conv weights.
    """
    weights, meta, raw = [], [], []
    cin = in_channel
    for i, cout in enumerate(out_channels):
        blk_w, blk_m, blk_r = [], [], []
        strides = [layer_strides[i]] + [1] * layer_nums[i]
        cur_in = cin
        for s in strides:
            key, sub = jax.random.split(key)
            fan_out = cout * 3 * 3
            std = np.sqrt(2.0 / fan_out)
            w = std * jax.random.normal(sub, (3, 3, cur_in, cout), dtype=jnp.float32)
            gamma = jnp.ones((cout,), jnp.float32)
            beta = jnp.zeros((cout,), jnp.float32)
            mean = jnp.zeros((cout,), jnp.float32)
            var = jnp.ones((cout,), jnp.float32)
            scale = gamma / jnp.sqrt(var + eps)
            bias = beta - mean * scale

            # Fold BN scale into the weights; pad K -> multiple of 128 and
            # Cout -> multiple of 128 (lane-dense output); cast to bf16.
            k_raw = 9 * cur_in
            k_pad, _ = _k_tiling(k_raw)
            n_pad = _round_up(cout, 128)
            w_mat = (w * scale[None, None, None, :]).reshape(k_raw, cout)
            w_mat = jnp.pad(w_mat, ((0, k_pad - k_raw), (0, n_pad - cout)))
            bias_row = jnp.pad(bias, (0, n_pad - cout)).reshape(1, n_pad)

            blk_w.append((w_mat.astype(jnp.bfloat16), bias_row))
            blk_m.append((int(s), int(cur_in), int(cout)))
            blk_r.append(dict(w=w, scale=scale, bias=bias, stride=int(s)))
            cur_in = cout
        cin = cout
        weights.append(blk_w)
        meta.append(blk_m)
        raw.append(blk_r)
    return weights, meta, raw


def build_backbone_forward(weights, meta):
    """Jitted Backbone.forward: x (N,C,H,W) -> list of per-stage NCHW outputs."""
    # TODO(synk): BatchNorm training-mode batch statistics are not modeled;
    # BN is applied in eval mode (folded scale/bias), the standard inference
    # semantics of the module.
    def fwd(ws, x_nchw):
        x = jnp.transpose(x_nchw, (0, 2, 3, 1))        # NCHW -> NHWC once
        stage_outs = []
        for bi, blk in enumerate(ws):
            for li, (w_mat, bias_row) in enumerate(blk):
                stride, _, cout = meta[bi][li]
                x = conv3x3_bn_relu(x, w_mat, bias_row, stride, cout)
            stage_outs.append(x)
        # NHWC -> NCHW only for the returned stage outputs (module API).
        return [jnp.transpose(o, (0, 3, 1, 2)) for o in stage_outs]

    jitted = jax.jit(fwd)
    return lambda x: jitted(weights, x)


def backbone_reference(raw_params, x_nchw):
    """Pure-JAX f32 reference (lax conv) for correctness checking."""
    x = x_nchw
    outs = []
    for block in raw_params:
        for layer in block:
            w = jnp.transpose(layer["w"], (3, 2, 0, 1))  # (Cout, Cin, 3, 3)
            x = jax.lax.conv_general_dilated(
                x, w,
                window_strides=(layer["stride"], layer["stride"]),
                padding=((1, 1), (1, 1)),
                dimension_numbers=("NCHW", "OIHW", "NCHW"))
            x = x * layer["scale"][None, :, None, None] + layer["bias"][None, :, None, None]
            x = jnp.maximum(x, 0.0)
        outs.append(x)
    return outs


if __name__ == "__main__":
    key = jax.random.PRNGKey(0)
    in_channel = 4
    out_channels = [8, 16, 32]
    layer_nums = [1, 1, 1]
    layer_strides = [2, 2, 2]

    key, pkey, xkey = jax.random.split(key, 3)
    weights, meta, raw = init_backbone_params(pkey, in_channel, out_channels,
                                              layer_nums, layer_strides)
    x = jax.random.normal(xkey, (2, in_channel, 16, 16), dtype=jnp.float32)

    forward = build_backbone_forward(weights, meta)
    outs = forward(x)
    outs = [jax.block_until_ready(o) for o in outs]

    expected_shapes = [(2, 8, 8, 8), (2, 16, 4, 4), (2, 32, 2, 2)]
    refs = backbone_reference(raw, x)
    for o, r, es in zip(outs, refs, expected_shapes):
        assert o.shape == es, (o.shape, es)
        # MXU operands are bf16 (per perf review) with f32 accumulation, so
        # compare against the f32 reference with a slightly looser tolerance.
        np.testing.assert_allclose(np.asarray(o), np.asarray(r),
                                   rtol=5e-2, atol=5e-2)

    print("KERNEL_OK")
</pallas_src>

<mosaic_0001>
module attributes {stable_mosaic.version = 11 : i64} {
  func.func @_matmul_bias_relu_kernel(%arg0: i32, %arg1: i32, %arg2: i32, %arg3: memref<128x128xbf16, #tpu.memory_space<vmem>>, %arg4: memref<128x128xbf16, #tpu.memory_space<vmem>>, %arg5: memref<1x128xf32, #tpu.memory_space<vmem>>, %arg6: memref<128x128xf32, #tpu.memory_space<vmem>>, %arg7: memref<128x128xf32, #tpu.memory_space<vmem>>) attributes {dimension_semantics = [#tpu.dimension_semantics<parallel>, #tpu.dimension_semantics<parallel>, #tpu.dimension_semantics<arbitrary>], iteration_bounds = array<i64: 1, 1, 1>, scalar_prefetch = 0 : i64, scratch_operands = 1 : i64, tpu.core_type = #tpu.core_type<tc>, window_params = [{transform_indices = @transform_0, window_bounds = array<i64: 128, 128>}, {transform_indices = @transform_1, window_bounds = array<i64: 128, 128>}, {transform_indices = @transform_2, window_bounds = array<i64: 1, 128>}, {transform_indices = @transform_3, window_bounds = array<i64: 128, 128>}]} {
    %c0_i32 = arith.constant 0 : i32
    %0 = arith.cmpi eq, %arg2, %c0_i32 : i32
    %1 = arith.extui %0 : i1 to i32
    %c0_i32_0 = arith.constant 0 : i32
    %2 = arith.cmpi ne, %1, %c0_i32_0 : i32
    scf.if %2 {
      %cst_10 = arith.constant 0.000000e+00 : f32
      %12 = vector.broadcast %cst_10 : f32 to vector<128x128xf32>
      %c0_11 = arith.constant 0 : index
      %c0_12 = arith.constant 0 : index
      %13 = vector.load %arg7[%c0_11, %c0_12] : memref<128x128xf32, #tpu.memory_space<vmem>>, vector<128x128xf32>
      tpu.vector_store %arg7[%c0_11, %c0_12], %12 {strides = array<i32>} : memref<128x128xf32, #tpu.memory_space<vmem>>, vector<128x128xf32>,
    } else {
    }
    %c0 = arith.constant 0 : index
    %c0_1 = arith.constant 0 : index
    %3 = vector.load %arg7[%c0, %c0_1] : memref<128x128xf32, #tpu.memory_space<vmem>>, vector<128x128xf32>
    %c0_2 = arith.constant 0 : index
    %c0_3 = arith.constant 0 : index
    %4 = vector.load %arg3[%c0_2, %c0_3] : memref<128x128xbf16, #tpu.memory_space<vmem>>, vector<128x128xbf16>
    %c0_4 = arith.constant 0 : index
    %c0_5 = arith.constant 0 : index
    %5 = vector.load %arg4[%c0_4, %c0_5] : memref<128x128xbf16, #tpu.memory_space<vmem>>, vector<128x128xbf16>
    %cst = arith.constant dense<0.000000e+00> : vector<128x128xf32>
    %6 = tpu.matmul %4, %5, %cst {dimension_numbers = #tpu.dot_dimension_numbers<[1], [0], [0], [1], [0, 0, 1, 1], [], []>} : vector<128x128xbf16>, vector<128x128xbf16>, vector<128x128xf32> -> vector<128x128xf32>
    %7 = arith.addf %3, %6 : vector<128x128xf32>
    %c0_6 = arith.constant 0 : index
    %c0_7 = arith.constant 0 : index
    %8 = vector.load %arg7[%c0_6, %c0_7] : memref<128x128xf32, #tpu.memory_space<vmem>>, vector<128x128xf32>
    tpu.vector_store %arg7[%c0_6, %c0_7], %7 {strides = array<i32>} : memref<128x128xf32, #tpu.memory_space<vmem>>, vector<128x128xf32>,
    %c0_i32_8 = arith.constant 0 : i32
    %9 = arith.cmpi eq, %arg2, %c0_i32_8 : i32
    %10 = arith.extui %9 : i1 to i32
    %c0_i32_9 = arith.constant 0 : i32
    %11 = arith.cmpi ne, %10, %c0_i32_9 : i32
    scf.if %11 {
      %c0_10 = arith.constant 0 : index
      %c0_11 = arith.constant 0 : index
      %12 = vector.load %arg7[%c0_10, %c0_11] : memref<128x128xf32, #tpu.memory_space<vmem>>, vector<128x128xf32>
      %c0_12 = arith.constant 0 : index
      %c0_13 = arith.constant 0 : index
      %13 = vector.load %arg5[%c0_12, %c0_13] : memref<1x128xf32, #tpu.memory_space<vmem>>, vector<1x128xf32>
      %14 = vector.broadcast %13 : vector<1x128xf32> to vector<128x128xf32>
      %15 = arith.addf %12, %14 : vector<128x128xf32>
      %cst_14 = arith.constant 0.000000e+00 : f32
      %16 = vector.broadcast %cst_14 : f32 to vector<128x128xf32>
      %17 = arith.maximumf %15, %16 : vector<128x128xf32>
      %c0_15 = arith.constant 0 : index
      %c0_16 = arith.constant 0 : index
      %18 = vector.load %arg6[%c0_15, %c0_16] : memref<128x128xf32, #tpu.memory_space<vmem>>, vector<128x128xf32>
      tpu.vector_store %arg6[%c0_15, %c0_16], %17 {strides = array<i32>} : memref<128x128xf32, #tpu.memory_space<vmem>>, vector<128x128xf32>,
    } else {
    }
    return
  }
  func.func @transform_0(%arg0: i32, %arg1: i32, %arg2: i32) -> (i32, i32) {
    %c0_i32 = arith.constant 0 : i32
    return %arg0, %arg2 : i32, i32
  }
  func.func @transform_1(%arg0: i32, %arg1: i32, %arg2: i32) -> (i32, i32) {
    %c0_i32 = arith.constant 0 : i32
    return %arg2, %arg1 : i32, i32
  }
  func.func @transform_2(%arg0: i32, %arg1: i32, %arg2: i32) -> (i32, i32) {
    %c0_i32 = arith.constant 0 : i32
    %c0_i32_0 = arith.constant 0 : i32
    return %c0_i32, %arg1 : i32, i32
  }
  func.func @transform_3(%arg0: i32, %arg1: i32, %arg2: i32) -> (i32, i32) {
    %c0_i32 = arith.constant 0 : i32
    return %arg0, %arg1 : i32, i32
  }
}

module attributes {stable_mosaic.version = 11 : i64} {
  func.func @_matmul_bias_relu_kernel(%arg0: i32, %arg1: i32, %arg2: i32, %arg3: memref<32x128xbf16, #tpu.memory_space<vmem>>, %arg4: memref<128x128xbf16, #tpu.memory_space<vmem>>, %arg5: memref<1x128xf32, #tpu.memory_space<vmem>>, %arg6: memref<32x128xf32, #tpu.memory_space<vmem>>, %arg7: memref<32x128xf32, #tpu.memory_space<vmem>>) attributes {dimension_semantics = [#tpu.dimension_semantics<parallel>, #tpu.dimension_semantics<parallel>, #tpu.dimension_semantics<arbitrary>], iteration_bounds = array<i64: 1, 1, 1>, scalar_prefetch = 0 : i64, scratch_operands = 1 : i64, tpu.core_type = #tpu.core_type<tc>, window_params = [{transform_indices = @transform_0, window_bounds = array<i64: 32, 128>}, {transform_indices = @transform_1, window_bounds = array<i64: 128, 128>}, {transform_indices = @transform_2, window_bounds = array<i64: 1, 128>}, {transform_indices = @transform_3, window_bounds = array<i64: 32, 128>}]} {
    %c0_i32 = arith.constant 0 : i32
    %0 = arith.cmpi eq, %arg2, %c0_i32 : i32
    %1 = arith.extui %0 : i1 to i32
    %c0_i32_0 = arith.constant 0 : i32
    %2 = arith.cmpi ne, %1, %c0_i32_0 : i32
    scf.if %2 {
      %cst_10 = arith.constant 0.000000e+00 : f32
      %12 = vector.broadcast %cst_10 : f32 to vector<32x128xf32>
      %c0_11 = arith.constant 0 : index
      %c0_12 = arith.constant 0 : index
      %13 = vector.load %arg7[%c0_11, %c0_12] : memref<32x128xf32, #tpu.memory_space<vmem>>, vector<32x128xf32>
      tpu.vector_store %arg7[%c0_11, %c0_12], %12 {strides = array<i32>} : memref<32x128xf32, #tpu.memory_space<vmem>>, vector<32x128xf32>,
    } else {
    }
    %c0 = arith.constant 0 : index
    %c0_1 = arith.constant 0 : index
    %3 = vector.load %arg7[%c0, %c0_1] : memref<32x128xf32, #tpu.memory_space<vmem>>, vector<32x128xf32>
    %c0_2 = arith.constant 0 : index
    %c0_3 = arith.constant 0 : index
    %4 = vector.load %arg3[%c0_2, %c0_3] : memref<32x128xbf16, #tpu.memory_space<vmem>>, vector<32x128xbf16>
    %c0_4 = arith.constant 0 : index
    %c0_5 = arith.constant 0 : index
    %5 = vector.load %arg4[%c0_4, %c0_5] : memref<128x128xbf16, #tpu.memory_space<vmem>>, vector<128x128xbf16>
    %cst = arith.constant dense<0.000000e+00> : vector<32x128xf32>
    %6 = tpu.matmul %4, %5, %cst {dimension_numbers = #tpu.dot_dimension_numbers<[1], [0], [0], [1], [0, 0, 1, 1], [], []>} : vector<32x128xbf16>, vector<128x128xbf16>, vector<32x128xf32> -> vector<32x128xf32>
    %7 = arith.addf %3, %6 : vector<32x128xf32>
    %c0_6 = arith.constant 0 : index
    %c0_7 = arith.constant 0 : index
    %8 = vector.load %arg7[%c0_6, %c0_7] : memref<32x128xf32, #tpu.memory_space<vmem>>, vector<32x128xf32>
    tpu.vector_store %arg7[%c0_6, %c0_7], %7 {strides = array<i32>} : memref<32x128xf32, #tpu.memory_space<vmem>>, vector<32x128xf32>,
    %c0_i32_8 = arith.constant 0 : i32
    %9 = arith.cmpi eq, %arg2, %c0_i32_8 : i32
    %10 = arith.extui %9 : i1 to i32
    %c0_i32_9 = arith.constant 0 : i32
    %11 = arith.cmpi ne, %10, %c0_i32_9 : i32
    scf.if %11 {
      %c0_10 = arith.constant 0 : index
      %c0_11 = arith.constant 0 : index
      %12 = vector.load %arg7[%c0_10, %c0_11] : memref<32x128xf32, #tpu.memory_space<vmem>>, vector<32x128xf32>
      %c0_12 = arith.constant 0 : index
      %c0_13 = arith.constant 0 : index
      %13 = vector.load %arg5[%c0_12, %c0_13] : memref<1x128xf32, #tpu.memory_space<vmem>>, vector<1x128xf32>
      %14 = vector.broadcast %13 : vector<1x128xf32> to vector<32x128xf32>
      %15 = arith.addf %12, %14 : vector<32x128xf32>
      %cst_14 = arith.constant 0.000000e+00 : f32
      %16 = vector.broadcast %cst_14 : f32 to vector<32x128xf32>
      %17 = arith.maximumf %15, %16 : vector<32x128xf32>
      %c0_15 = arith.constant 0 : index
      %c0_16 = arith.constant 0 : index
      %18 = vector.load %arg6[%c0_15, %c0_16] : memref<32x128xf32, #tpu.memory_space<vmem>>, vector<32x128xf32>
      tpu.vector_store %arg6[%c0_15, %c0_16], %17 {strides = array<i32>} : memref<32x128xf32, #tpu.memory_space<vmem>>, vector<32x128xf32>,
    } else {
    }
    return
  }
  func.func @transform_0(%arg0: i32, %arg1: i32, %arg2: i32) -> (i32, i32) {
    %c0_i32 = arith.constant 0 : i32
    return %arg0, %arg2 : i32, i32
  }
  func.func @transform_1(%arg0: i32, %arg1: i32, %arg2: i32) -> (i32, i32) {
    %c0_i32 = arith.constant 0 : i32
    return %arg2, %arg1 : i32, i32
  }
  func.func @transform_2(%arg0: i32, %arg1: i32, %arg2: i32) -> (i32, i32) {
    %c0_i32 = arith.constant 0 : i32
    %c0_i32_0 = arith.constant 0 : i32
    return %c0_i32, %arg1 : i32, i32
  }
  func.func @transform_3(%arg0: i32, %arg1: i32, %arg2: i32) -> (i32, i32) {
    %c0_i32 = arith.constant 0 : i32
    return %arg0, %arg1 : i32, i32
  }
}

module attributes {stable_mosaic.version = 11 : i64} {
  func.func @_matmul_bias_relu_kernel(%arg0: i32, %arg1: i32, %arg2: i32, %arg3: memref<32x256xbf16, #tpu.memory_space<vmem>>, %arg4: memref<256x128xbf16, #tpu.memory_space<vmem>>, %arg5: memref<1x128xf32, #tpu.memory_space<vmem>>, %arg6: memref<32x128xf32, #tpu.memory_space<vmem>>, %arg7: memref<32x128xf32, #tpu.memory_space<vmem>>) attributes {dimension_semantics = [#tpu.dimension_semantics<parallel>, #tpu.dimension_semantics<parallel>, #tpu.dimension_semantics<arbitrary>], iteration_bounds = array<i64: 1, 1, 1>, scalar_prefetch = 0 : i64, scratch_operands = 1 : i64, tpu.core_type = #tpu.core_type<tc>, window_params = [{transform_indices = @transform_0, window_bounds = array<i64: 32, 256>}, {transform_indices = @transform_1, window_bounds = array<i64: 256, 128>}, {transform_indices = @transform_2, window_bounds = array<i64: 1, 128>}, {transform_indices = @transform_3, window_bounds = array<i64: 32, 128>}]} {
    %c0_i32 = arith.constant 0 : i32
    %0 = arith.cmpi eq, %arg2, %c0_i32 : i32
    %1 = arith.extui %0 : i1 to i32
    %c0_i32_0 = arith.constant 0 : i32
    %2 = arith.cmpi ne, %1, %c0_i32_0 : i32
    scf.if %2 {
      %cst_10 = arith.constant 0.000000e+00 : f32
      %12 = vector.broadcast %cst_10 : f32 to vector<32x128xf32>
      %c0_11 = arith.constant 0 : index
      %c0_12 = arith.constant 0 : index
      %13 = vector.load %arg7[%c0_11, %c0_12] : memref<32x128xf32, #tpu.memory_space<vmem>>, vector<32x128xf32>
      tpu.vector_store %arg7[%c0_11, %c0_12], %12 {strides = array<i32>} : memref<32x128xf32, #tpu.memory_space<vmem>>, vector<32x128xf32>,
    } else {
    }
    %c0 = arith.constant 0 : index
    %c0_1 = arith.constant 0 : index
    %3 = vector.load %arg7[%c0, %c0_1] : memref<32x128xf32, #tpu.memory_space<vmem>>, vector<32x128xf32>
    %c0_2 = arith.constant 0 : index
    %c0_3 = arith.constant 0 : index
    %4 = vector.load %arg3[%c0_2, %c0_3] : memref<32x256xbf16, #tpu.memory_space<vmem>>, vector<32x256xbf16>
    %c0_4 = arith.constant 0 : index
    %c0_5 = arith.constant 0 : index
    %5 = vector.load %arg4[%c0_4, %c0_5] : memref<256x128xbf16, #tpu.memory_space<vmem>>, vector<256x128xbf16>
    %cst = arith.constant dense<0.000000e+00> : vector<32x128xf32>
    %6 = tpu.matmul %4, %5, %cst {dimension_numbers = #tpu.dot_dimension_numbers<[1], [0], [0], [1], [0, 0, 1, 1], [], []>} : vector<32x256xbf16>, vector<256x128xbf16>, vector<32x128xf32> -> vector<32x128xf32>
    %7 = arith.addf %3, %6 : vector<32x128xf32>
    %c0_6 = arith.constant 0 : index
    %c0_7 = arith.constant 0 : index
    %8 = vector.load %arg7[%c0_6, %c0_7] : memref<32x128xf32, #tpu.memory_space<vmem>>, vector<32x128xf32>
    tpu.vector_store %arg7[%c0_6, %c0_7], %7 {strides = array<i32>} : memref<32x128xf32, #tpu.memory_space<vmem>>, vector<32x128xf32>,
    %c0_i32_8 = arith.constant 0 : i32
    %9 = arith.cmpi eq, %arg2, %c0_i32_8 : i32
    %10 = arith.extui %9 : i1 to i32
    %c0_i32_9 = arith.constant 0 : i32
    %11 = arith.cmpi ne, %10, %c0_i32_9 : i32
    scf.if %11 {
      %c0_10 = arith.constant 0 : index
      %c0_11 = arith.constant 0 : index
      %12 = vector.load %arg7[%c0_10, %c0_11] : memref<32x128xf32, #tpu.memory_space<vmem>>, vector<32x128xf32>
      %c0_12 = arith.constant 0 : index
      %c0_13 = arith.constant 0 : index
      %13 = vector.load %arg5[%c0_12, %c0_13] : memref<1x128xf32, #tpu.memory_space<vmem>>, vector<1x128xf32>
      %14 = vector.broadcast %13 : vector<1x128xf32> to vector<32x128xf32>
      %15 = arith.addf %12, %14 : vector<32x128xf32>
      %cst_14 = arith.constant 0.000000e+00 : f32
      %16 = vector.broadcast %cst_14 : f32 to vector<32x128xf32>
      %17 = arith.maximumf %15, %16 : vector<32x128xf32>
      %c0_15 = arith.constant 0 : index
      %c0_16 = arith.constant 0 : index
      %18 = vector.load %arg6[%c0_15, %c0_16] : memref<32x128xf32, #tpu.memory_space<vmem>>, vector<32x128xf32>
      tpu.vector_store %arg6[%c0_15, %c0_16], %17 {strides = array<i32>} : memref<32x128xf32, #tpu.memory_space<vmem>>, vector<32x128xf32>,
    } else {
    }
    return
  }
  func.func @transform_0(%arg0: i32, %arg1: i32, %arg2: i32) -> (i32, i32) {
    %c0_i32 = arith.constant 0 : i32
    return %arg0, %arg2 : i32, i32
  }
  func.func @transform_1(%arg0: i32, %arg1: i32, %arg2: i32) -> (i32, i32) {
    %c0_i32 = arith.constant 0 : i32
    return %arg2, %arg1 : i32, i32
  }
  func.func @transform_2(%arg0: i32, %arg1: i32, %arg2: i32) -> (i32, i32) {
    %c0_i32 = arith.constant 0 : i32
    %c0_i32_0 = arith.constant 0 : i32
    return %c0_i32, %arg1 : i32, i32
  }
  func.func @transform_3(%arg0: i32, %arg1: i32, %arg2: i32) -> (i32, i32) {
    %c0_i32 = arith.constant 0 : i32
    return %arg0, %arg1 : i32, i32
  }
}

module attributes {stable_mosaic.version = 11 : i64} {
  func.func @_matmul_bias_relu_kernel(%arg0: i32, %arg1: i32, %arg2: i32, %arg3: memref<16x256xbf16, #tpu.memory_space<vmem>>, %arg4: memref<256x128xbf16, #tpu.memory_space<vmem>>, %arg5: memref<1x128xf32, #tpu.memory_space<vmem>>, %arg6: memref<16x128xf32, #tpu.memory_space<vmem>>, %arg7: memref<16x128xf32, #tpu.memory_space<vmem>>) attributes {dimension_semantics = [#tpu.dimension_semantics<parallel>, #tpu.dimension_semantics<parallel>, #tpu.dimension_semantics<arbitrary>], iteration_bounds = array<i64: 1, 1, 1>, scalar_prefetch = 0 : i64, scratch_operands = 1 : i64, tpu.core_type = #tpu.core_type<tc>, window_params = [{transform_indices = @transform_0, window_bounds = array<i64: 16, 256>}, {transform_indices = @transform_1, window_bounds = array<i64: 256, 128>}, {transform_indices = @transform_2, window_bounds = array<i64: 1, 128>}, {transform_indices = @transform_3, window_bounds = array<i64: 16, 128>}]} {
    %c0_i32 = arith.constant 0 : i32
    %0 = arith.cmpi eq, %arg2, %c0_i32 : i32
    %1 = arith.extui %0 : i1 to i32
    %c0_i32_0 = arith.constant 0 : i32
    %2 = arith.cmpi ne, %1, %c0_i32_0 : i32
    scf.if %2 {
      %cst_10 = arith.constant 0.000000e+00 : f32
      %12 = vector.broadcast %cst_10 : f32 to vector<16x128xf32>
      %c0_11 = arith.constant 0 : index
      %c0_12 = arith.constant 0 : index
      %13 = vector.load %arg7[%c0_11, %c0_12] : memref<16x128xf32, #tpu.memory_space<vmem>>, vector<16x128xf32>
      tpu.vector_store %arg7[%c0_11, %c0_12], %12 {strides = array<i32>} : memref<16x128xf32, #tpu.memory_space<vmem>>, vector<16x128xf32>,
    } else {
    }
    %c0 = arith.constant 0 : index
    %c0_1 = arith.constant 0 : index
    %3 = vector.load %arg7[%c0, %c0_1] : memref<16x128xf32, #tpu.memory_space<vmem>>, vector<16x128xf32>
    %c0_2 = arith.constant 0 : index
    %c0_3 = arith.constant 0 : index
    %4 = vector.load %arg3[%c0_2, %c0_3] : memref<16x256xbf16, #tpu.memory_space<vmem>>, vector<16x256xbf16>
    %c0_4 = arith.constant 0 : index
    %c0_5 = arith.constant 0 : index
    %5 = vector.load %arg4[%c0_4, %c0_5] : memref<256x128xbf16, #tpu.memory_space<vmem>>, vector<256x128xbf16>
    %cst = arith.constant dense<0.000000e+00> : vector<16x128xf32>
    %6 = tpu.matmul %4, %5, %cst {dimension_numbers = #tpu.dot_dimension_numbers<[1], [0], [0], [1], [0, 0, 1, 1], [], []>} : vector<16x256xbf16>, vector<256x128xbf16>, vector<16x128xf32> -> vector<16x128xf32>
    %7 = arith.addf %3, %6 : vector<16x128xf32>
    %c0_6 = arith.constant 0 : index
    %c0_7 = arith.constant 0 : index
    %8 = vector.load %arg7[%c0_6, %c0_7] : memref<16x128xf32, #tpu.memory_space<vmem>>, vector<16x128xf32>
    tpu.vector_store %arg7[%c0_6, %c0_7], %7 {strides = array<i32>} : memref<16x128xf32, #tpu.memory_space<vmem>>, vector<16x128xf32>,
    %c0_i32_8 = arith.constant 0 : i32
    %9 = arith.cmpi eq, %arg2, %c0_i32_8 : i32
    %10 = arith.extui %9 : i1 to i32
    %c0_i32_9 = arith.constant 0 : i32
    %11 = arith.cmpi ne, %10, %c0_i32_9 : i32
    scf.if %11 {
      %c0_10 = arith.constant 0 : index
      %c0_11 = arith.constant 0 : index
      %12 = vector.load %arg7[%c0_10, %c0_11] : memref<16x128xf32, #tpu.memory_space<vmem>>, vector<16x128xf32>
      %c0_12 = arith.constant 0 : index
      %c0_13 = arith.constant 0 : index
      %13 = vector.load %arg5[%c0_12, %c0_13] : memref<1x128xf32, #tpu.memory_space<vmem>>, vector<1x128xf32>
      %14 = vector.broadcast %13 : vector<1x128xf32> to vector<16x128xf32>
      %15 = arith.addf %12, %14 : vector<16x128xf32>
      %cst_14 = arith.constant 0.000000e+00 : f32
      %16 = vector.broadcast %cst_14 : f32 to vector<16x128xf32>
      %17 = arith.maximumf %15, %16 : vector<16x128xf32>
      %c0_15 = arith.constant 0 : index
      %c0_16 = arith.constant 0 : index
      %18 = vector.load %arg6[%c0_15, %c0_16] : memref<16x128xf32, #tpu.memory_space<vmem>>, vector<16x128xf32>
      tpu.vector_store %arg6[%c0_15, %c0_16], %17 {strides = array<i32>} : memref<16x128xf32, #tpu.memory_space<vmem>>, vector<16x128xf32>,
    } else {
    }
    return
  }
  func.func @transform_0(%arg0: i32, %arg1: i32, %arg2: i32) -> (i32, i32) {
    %c0_i32 = arith.constant 0 : i32
    return %arg0, %arg2 : i32, i32
  }
  func.func @transform_1(%arg0: i32, %arg1: i32, %arg2: i32) -> (i32, i32) {
    %c0_i32 = arith.constant 0 : i32
    return %arg2, %arg1 : i32, i32
  }
  func.func @transform_2(%arg0: i32, %arg1: i32, %arg2: i32) -> (i32, i32) {
    %c0_i32 = arith.constant 0 : i32
    %c0_i32_0 = arith.constant 0 : i32
    return %c0_i32, %arg1 : i32, i32
  }
  func.func @transform_3(%arg0: i32, %arg1: i32, %arg2: i32) -> (i32, i32) {
    %c0_i32 = arith.constant 0 : i32
    return %arg0, %arg1 : i32, i32
  }
}

module attributes {stable_mosaic.version = 11 : i64} {
  func.func @_matmul_bias_relu_kernel(%arg0: i32, %arg1: i32, %arg2: i32, %arg3: memref<16x128xbf16, #tpu.memory_space<vmem>>, %arg4: memref<128x128xbf16, #tpu.memory_space<vmem>>, %arg5: memref<1x128xf32, #tpu.memory_space<vmem>>, %arg6: memref<16x128xf32, #tpu.memory_space<vmem>>, %arg7: memref<16x128xf32, #tpu.memory_space<vmem>>) attributes {dimension_semantics = [#tpu.dimension_semantics<parallel>, #tpu.dimension_semantics<parallel>, #tpu.dimension_semantics<arbitrary>], iteration_bounds = array<i64: 1, 1, 3>, scalar_prefetch = 0 : i64, scratch_operands = 1 : i64, tpu.core_type = #tpu.core_type<tc>, window_params = [{transform_indices = @transform_0, window_bounds = array<i64: 16, 128>}, {transform_indices = @transform_1, window_bounds = array<i64: 128, 128>}, {transform_indices = @transform_2, window_bounds = array<i64: 1, 128>}, {transform_indices = @transform_3, window_bounds = array<i64: 16, 128>}]} {
    %c0_i32 = arith.constant 0 : i32
    %0 = arith.cmpi eq, %arg2, %c0_i32 : i32
    %1 = arith.extui %0 : i1 to i32
    %c0_i32_0 = arith.constant 0 : i32
    %2 = arith.cmpi ne, %1, %c0_i32_0 : i32
    scf.if %2 {
      %cst_9 = arith.constant 0.000000e+00 : f32
      %12 = vector.broadcast %cst_9 : f32 to vector<16x128xf32>
      %c0_10 = arith.constant 0 : index
      %c0_11 = arith.constant 0 : index
      %13 = vector.load %arg7[%c0_10, %c0_11] : memref<16x128xf32, #tpu.memory_space<vmem>>, vector<16x128xf32>
      tpu.vector_store %arg7[%c0_10, %c0_11], %12 {strides = array<i32>} : memref<16x128xf32, #tpu.memory_space<vmem>>, vector<16x128xf32>,
    } else {
    }
    %c0 = arith.constant 0 : index
    %c0_1 = arith.constant 0 : index
    %3 = vector.load %arg7[%c0, %c0_1] : memref<16x128xf32, #tpu.memory_space<vmem>>, vector<16x128xf32>
    %c0_2 = arith.constant 0 : index
    %c0_3 = arith.constant 0 : index
    %4 = vector.load %arg3[%c0_2, %c0_3] : memref<16x128xbf16, #tpu.memory_space<vmem>>, vector<16x128xbf16>
    %c0_4 = arith.constant 0 : index
    %c0_5 = arith.constant 0 : index
    %5 = vector.load %arg4[%c0_4, %c0_5] : memref<128x128xbf16, #tpu.memory_space<vmem>>, vector<128x128xbf16>
    %cst = arith.constant dense<0.000000e+00> : vector<16x128xf32>
    %6 = tpu.matmul %4, %5, %cst {dimension_numbers = #tpu.dot_dimension_numbers<[1], [0], [0], [1], [0, 0, 1, 1], [], []>} : vector<16x128xbf16>, vector<128x128xbf16>, vector<16x128xf32> -> vector<16x128xf32>
    %7 = arith.addf %3, %6 : vector<16x128xf32>
    %c0_6 = arith.constant 0 : index
    %c0_7 = arith.constant 0 : index
    %8 = vector.load %arg7[%c0_6, %c0_7] : memref<16x128xf32, #tpu.memory_space<vmem>>, vector<16x128xf32>
    tpu.vector_store %arg7[%c0_6, %c0_7], %7 {strides = array<i32>} : memref<16x128xf32, #tpu.memory_space<vmem>>, vector<16x128xf32>,
    %c2_i32 = arith.constant 2 : i32
    %9 = arith.cmpi eq, %arg2, %c2_i32 : i32
    %10 = arith.extui %9 : i1 to i32
    %c0_i32_8 = arith.constant 0 : i32
    %11 = arith.cmpi ne, %10, %c0_i32_8 : i32
    scf.if %11 {
      %c0_9 = arith.constant 0 : index
      %c0_10 = arith.constant 0 : index
      %12 = vector.load %arg7[%c0_9, %c0_10] : memref<16x128xf32, #tpu.memory_space<vmem>>, vector<16x128xf32>
      %c0_11 = arith.constant 0 : index
      %c0_12 = arith.constant 0 : index
      %13 = vector.load %arg5[%c0_11, %c0_12] : memref<1x128xf32, #tpu.memory_space<vmem>>, vector<1x128xf32>
      %14 = vector.broadcast %13 : vector<1x128xf32> to vector<16x128xf32>
      %15 = arith.addf %12, %14 : vector<16x128xf32>
      %cst_13 = arith.constant 0.000000e+00 : f32
      %16 = vector.broadcast %cst_13 : f32 to vector<16x128xf32>
      %17 = arith.maximumf %15, %16 : vector<16x128xf32>
      %c0_14 = arith.constant 0 : index
      %c0_15 = arith.constant 0 : index
      %18 = vector.load %arg6[%c0_14, %c0_15] : memref<16x128xf32, #tpu.memory_space<vmem>>, vector<16x128xf32>
      tpu.vector_store %arg6[%c0_14, %c0_15], %17 {strides = array<i32>} : memref<16x128xf32, #tpu.memory_space<vmem>>, vector<16x128xf32>,
    } else {
    }
    return
  }
  func.func @transform_0(%arg0: i32, %arg1: i32, %arg2: i32) -> (i32, i32) {
    %c0_i32 = arith.constant 0 : i32
    return %arg0, %arg2 : i32, i32
  }
  func.func @transform_1(%arg0: i32, %arg1: i32, %arg2: i32) -> (i32, i32) {
    %c0_i32 = arith.constant 0 : i32
    return %arg2, %arg1 : i32, i32
  }
  func.func @transform_2(%arg0: i32, %arg1: i32, %arg2: i32) -> (i32, i32) {
    %c0_i32 = arith.constant 0 : i32
    %c0_i32_0 = arith.constant 0 : i32
    return %c0_i32, %arg1 : i32, i32
  }
  func.func @transform_3(%arg0: i32, %arg1: i32, %arg2: i32) -> (i32, i32) {
    %c0_i32 = arith.constant 0 : i32
    return %arg0, %arg1 : i32, i32
  }
}

</mosaic_0001>

<bundles_post_ra>
// kernel: fwd.6
= control target key start
LH: loop header
LB: loop body
LE: loop exit
PB: predicated region body
PF: predicated region fallthrough
CT: control target
= control target key end

     0   :  { %s602_s1 = inlined_call_operand.vmem [shape: bf16[128,128], index: 1, kind: input, shape index: {}]   ;;  %s603_s0 = inlined_call_operand.vmem [shape: bf16[128,128], index: 0, kind: input, shape index: {}]   ;;  %s604_s2 = inlined_call_operand.vmem [shape: f32[1,128], index: 2, kind: input, shape index: {}]   ;;  %s605_s3 = inlined_call_operand.vmem [shape: f32[128,128], index: 3, kind: output, shape index: {}]  }
   0x1   :  { %v467_v0 = vld [vmem:[%s602_s1 + $0x38] sm:$0xff]   ;;  %v468_v1 = vld [vmem:[%s602_s1 + $0x30] sm:$0xff]   ;;  %v469_v2 = vld [vmem:[%s602_s1 + $0x28] sm:$0xff]  }
   0x2   :  { %419 = vmatprep.subr.bf16.mxu0 %v467_v0  ;;  %451 = vmatprep.subr.bf16.mxu1 %v467_v0  ;;  %v470_v3 = vld [vmem:[%s602_s1 + $0x20] sm:$0xff]   ;;  %v471_v6 = vld [vmem:[%s602_s1 + $0x18] sm:$0xff]   ;;  %v472_v7 = vld [vmem:[%s602_s1 + $0x10] sm:$0xff]  }
   0x3   :  { %420 = vmatpush3.bf16.msra.mxu0 %v467_v0  ;;  %459 = vmatpush3.bf16.msra.mxu1 %v467_v0  ;;  %v475_v4 = vld [vmem:[%s603_s0] sm:$0xff]   ;;  %v473_v8 = vld [vmem:[%s602_s1 + $0x8] sm:$0xff]   ;;  %v479_v12 = vld [vmem:[%s603_s0 + $0x10] sm:$0xff]  }
   0x4   :  { %421 = vmatprep.subr.bf16.mxu0 %v468_v1  ;;  %452 = vmatprep.subr.bf16.mxu1 %v468_v1  ;;  %v476_v5 = vld [vmem:[%s603_s0 + $0x20] sm:$0xff]   ;;  %v477_v10 = vld [vmem:[%s603_s0 + $0x8] sm:$0xff]   ;;  %v480_v13 = vld [vmem:[%s603_s0 + $0x30] sm:$0xff]  }
   0x5   :  { %435 = vmatprep.mubr.bf16.mxu0 %v475_v4  ;;  %443 = vmatprep.mubr.bf16.mxu1 %v476_v5  ;;  %v474_v9 = vld [vmem:[%s602_s1] sm:$0xff]   ;;  %v478_v11 = vld [vmem:[%s603_s0 + $0x28] sm:$0xff]   ;;  %v481_v14 = vld [vmem:[%s603_s0 + $0x18] sm:$0xff]  }
   0x6   :  { %v482_v15 = vld [vmem:[%s603_s0 + $0x38] sm:$0xff]   ;;  %v402_v16 = vld [vmem:[%s604_s2] ss:$0 sm:$0xff] }
   0x7   :  { %422 = vmatpush3.bf16.msra.mxu0 %v468_v1  ;;  %460 = vmatpush3.bf16.msra.mxu1 %v468_v1 }
   0x8   :  { %423 = vmatprep.subr.bf16.mxu0 %v469_v2  ;;  %453 = vmatprep.subr.bf16.mxu1 %v469_v2 }
   0xb   :  { %424 = vmatpush3.bf16.msra.mxu0 %v469_v2  ;;  %461 = vmatpush3.bf16.msra.mxu1 %v469_v2 }
   0xc   :  { %425 = vmatprep.subr.bf16.mxu0 %v470_v3  ;;  %454 = vmatprep.subr.bf16.mxu1 %v470_v3 }
   0xf   :  { %426 = vmatpush3.bf16.msra.mxu0 %v470_v3  ;;  %462 = vmatpush3.bf16.msra.mxu1 %v470_v3 }
  0x10   :  { %427 = vmatprep.subr.bf16.mxu0 %v471_v6  ;;  %455 = vmatprep.subr.bf16.mxu1 %v471_v6 }
  0x13   :  { %428 = vmatpush3.bf16.msra.mxu0 %v471_v6  ;;  %463 = vmatpush3.bf16.msra.mxu1 %v471_v6 }
  0x14   :  { %429 = vmatprep.subr.bf16.mxu0 %v472_v7  ;;  %456 = vmatprep.subr.bf16.mxu1 %v472_v7 }
  0x17   :  { %430 = vmatpush3.bf16.msra.mxu0 %v472_v7  ;;  %464 = vmatpush3.bf16.msra.mxu1 %v472_v7 }
  0x18   :  { %431 = vmatprep.subr.bf16.mxu0 %v473_v8  ;;  %457 = vmatprep.subr.bf16.mxu1 %v473_v8 }
  0x1b   :  { %432 = vmatpush3.bf16.msra.mxu0 %v473_v8  ;;  %465 = vmatpush3.bf16.msra.mxu1 %v473_v8 }
  0x1c   :  { %433 = vmatprep.subr.bf16.mxu0 %v474_v9  ;;  %458 = vmatprep.subr.bf16.mxu1 %v474_v9 }
  0x1f   :  { %434 = vmatpush3.bf16.msra.mxu0 %v474_v9  ;;  %466 = vmatpush3.bf16.msra.mxu1 %v474_v9 }
  0x22   :  { %436 = vmatmul.mubr.bf16.vlgmr.msra.gmra.mxu0 %v477_v10  ;;  %444 = vmatmul.mubr.bf16.vlgmr.msra.gmra.mxu1 %v478_v11 }
  0x23   :  { %439 = vmatprep.mubr.bf16.mxu0 %v479_v12  ;;  %447 = vmatprep.mubr.bf16.mxu1 %v480_v13 }
  0x2a   :  { %440 = vmatmul.mubr.bf16.gmra.mxu0 %v481_v14  ;;  %448 = vmatmul.mubr.bf16.gmra.mxu1 %v482_v15 }
  0xe2   :  { %v437_v17 = vpop.f32.mrf.mxu0  ;;  %v445_v18 = vpop.f32.mrf.mxu1 }
  0xe3   :  { %v336_v19 = vadd.f32 %v437_v17, %v402_v16  ;;  %v344_v20 = vadd.f32 %v445_v18, %v402_v16 }
  0xe4   :  { %v213_v21 = vpop.f32.mrf.mxu0  ;;  %v245_v22 = vpop.f32.mrf.mxu1 }
  0xe5   :  { %v352_v23 = vmax.f32 %v336_v19, 0.0  ;;  %v360_v24 = vmax.f32 %v344_v20, 0.0  ;;  %v334_v25 = vadd.f32 %v402_v16, %v213_v21  ;;  %v342_v26 = vadd.f32 %v402_v16, %v245_v22 }
  0xe6   :  { %v438_v27 = vpop.f32.mrf.mxu0  ;;  %v446_v28 = vpop.f32.mrf.mxu1 }
  0xe7   :  { %368 = vst [vmem:[%s605_s3 + $0x10] sm:$0xff] %v352_v23  ;;  %376 = vst [vmem:[%s605_s3 + $0x50] sm:$0xff] %v360_v24  ;;  %v350_v29 = vmax.f32 %v334_v25, 0.0  ;;  %v358_v30 = vmax.f32 %v342_v26, 0.0  ;;  %v337_v31 = vadd.f32 %v438_v27, %v402_v16  ;;  %v345_v32 = vadd.f32 %v446_v28, %v402_v16 }
  0xe8   :  { %v216_v33 = vpop.f32.mrf.mxu0  ;;  %v248_v34 = vpop.f32.mrf.mxu1 }
  0xe9   :  { %366 = vst [vmem:[%s605_s3] sm:$0xff] %v350_v29  ;;  %374 = vst [vmem:[%s605_s3 + $0x40] sm:$0xff] %v358_v30  ;;  %v353_v35 = vmax.f32 %v337_v31, 0.0  ;;  %v361_v36 = vmax.f32 %v345_v32, 0.0  ;;  %v335_v37 = vadd.f32 %v402_v16, %v216_v33  ;;  %v343_v38 = vadd.f32 %v402_v16, %v248_v34 }
  0xea   :  { %v441_v39 = vpop.f32.mrf.mxu0  ;;  %v449_v40 = vpop.f32.mrf.mxu1 }
  0xeb   :  { %369 = vst [vmem:[%s605_s3 + $0x18] sm:$0xff] %v353_v35  ;;  %377 = vst [vmem:[%s605_s3 + $0x58] sm:$0xff] %v361_v36  ;;  %v351_v41 = vmax.f32 %v335_v37, 0.0  ;;  %v359_v42 = vmax.f32 %v343_v38, 0.0  ;;  %v340_v43 = vadd.f32 %v441_v39, %v402_v16  ;;  %v348_v44 = vadd.f32 %v449_v40, %v402_v16 }
  0xec   :  { %v229_v45 = vpop.f32.mrf.mxu0  ;;  %v261_v46 = vpop.f32.mrf.mxu1 }
  0xed   :  { %367 = vst [vmem:[%s605_s3 + $0x8] sm:$0xff] %v351_v41  ;;  %375 = vst [vmem:[%s605_s3 + $0x48] sm:$0xff] %v359_v42  ;;  %v356_v47 = vmax.f32 %v340_v43, 0.0  ;;  %v364_v48 = vmax.f32 %v348_v44, 0.0  ;;  %v338_v49 = vadd.f32 %v402_v16, %v229_v45  ;;  %v346_v50 = vadd.f32 %v402_v16, %v261_v46 }
  0xee   :  { %v442_v51 = vpop.f32.mrf.mxu0  ;;  %v450_v52 = vpop.f32.mrf.mxu1 }
  0xef   :  { %372 = vst [vmem:[%s605_s3 + $0x30] sm:$0xff] %v356_v47  ;;  %380 = vst [vmem:[%s605_s3 + $0x70] sm:$0xff] %v364_v48  ;;  %v354_v53 = vmax.f32 %v338_v49, 0.0  ;;  %v362_v54 = vmax.f32 %v346_v50, 0.0  ;;  %v341_v55 = vadd.f32 %v442_v51, %v402_v16  ;;  %v349_v56 = vadd.f32 %v450_v52, %v402_v16 }
  0xf0   :  { %v232_v57 = vpop.f32.mrf.mxu0  ;;  %v264_v58 = vpop.f32.mrf.mxu1 }
  0xf1   :  { %370 = vst [vmem:[%s605_s3 + $0x20] sm:$0xff] %v354_v53  ;;  %378 = vst [vmem:[%s605_s3 + $0x60] sm:$0xff] %v362_v54  ;;  %v357_v59 = vmax.f32 %v341_v55, 0.0  ;;  %v365_v60 = vmax.f32 %v349_v56, 0.0  ;;  %v339_v61 = vadd.f32 %v402_v16, %v232_v57  ;;  %v347_v62 = vadd.f32 %v402_v16, %v264_v58 }
  0xf3   :  { %373 = vst [vmem:[%s605_s3 + $0x38] sm:$0xff] %v357_v59  ;;  %381 = vst [vmem:[%s605_s3 + $0x78] sm:$0xff] %v365_v60  ;;  %v355_v63 = vmax.f32 %v339_v61, 0.0  ;;  %v363_v0 = vmax.f32 %v347_v62, 0.0 }
  0xf5   :  { %371 = vst [vmem:[%s605_s3 + $0x28] sm:$0xff] %v355_v63  ;;  %379 = vst [vmem:[%s605_s3 + $0x68] sm:$0xff] %v363_v0 }

// kernel: fwd.8
= control target key start
LH: loop header
LB: loop body
LE: loop exit
PB: predicated region body
PF: predicated region fallthrough
CT: control target
= control target key end

     0   :  { %s310_s1 = inlined_call_operand.vmem [shape: bf16[128,128], index: 1, kind: input, shape index: {}]   ;;  %s311_s0 = inlined_call_operand.vmem [shape: bf16[32,128], index: 0, kind: input, shape index: {}]   ;;  %s312_s2 = inlined_call_operand.vmem [shape: f32[1,128], index: 2, kind: input, shape index: {}]   ;;  %s313_s3 = inlined_call_operand.vmem [shape: f32[32,128], index: 3, kind: output, shape index: {}]  }
   0x1   :  { %v235_v0 = vld [vmem:[%s310_s1 + $0x38] sm:$0xff]   ;;  %v236_v1 = vld [vmem:[%s310_s1 + $0x30] sm:$0xff]   ;;  %v237_v2 = vld [vmem:[%s310_s1 + $0x28] sm:$0xff]  }
   0x2   :  { %215 = vmatprep.subr.bf16.mxu0 %v235_v0  ;;  %v238_v3 = vld [vmem:[%s310_s1 + $0x20] sm:$0xff]   ;;  %v239_v5 = vld [vmem:[%s310_s1 + $0x18] sm:$0xff]   ;;  %v240_v6 = vld [vmem:[%s310_s1 + $0x10] sm:$0xff]  }
   0x3   :  { %216 = vmatpush3.bf16.msra.mxu0 %v235_v0  ;;  %v243_v4 = vld [vmem:[%s311_s0] sm:$0xff]   ;;  %v241_v7 = vld [vmem:[%s310_s1 + $0x8] sm:$0xff]  }
   0x4   :  { %217 = vmatprep.subr.bf16.mxu0 %v236_v1  ;;  %231 = vmatprep.mubr.bf16.mxu0 %v243_v4  ;;  %v242_v8 = vld [vmem:[%s310_s1] sm:$0xff]   ;;  %v244_v9 = vld [vmem:[%s311_s0 + $0x8] sm:$0xff]  }
   0x5   :  { %v204_v10 = vld [vmem:[%s312_s2] ss:$0 sm:$0xff] }
   0x7   :  { %218 = vmatpush3.bf16.msra.mxu0 %v236_v1 }
   0x8   :  { %219 = vmatprep.subr.bf16.mxu0 %v237_v2 }
   0xb   :  { %220 = vmatpush3.bf16.msra.mxu0 %v237_v2 }
   0xc   :  { %221 = vmatprep.subr.bf16.mxu0 %v238_v3 }
   0xf   :  { %222 = vmatpush3.bf16.msra.mxu0 %v238_v3 }
  0x10   :  { %223 = vmatprep.subr.bf16.mxu0 %v239_v5 }
  0x13   :  { %224 = vmatpush3.bf16.msra.mxu0 %v239_v5 }
  0x14   :  { %225 = vmatprep.subr.bf16.mxu0 %v240_v6 }
  0x17   :  { %226 = vmatpush3.bf16.msra.mxu0 %v240_v6 }
  0x18   :  { %227 = vmatprep.subr.bf16.mxu0 %v241_v7 }
  0x1b   :  { %228 = vmatpush3.bf16.msra.mxu0 %v241_v7 }
  0x1c   :  { %229 = vmatprep.subr.bf16.mxu0 %v242_v8 }
  0x1f   :  { %230 = vmatpush3.bf16.msra.mxu0 %v242_v8 }
  0x22   :  { %232 = vmatmul.mubr.bf16.vlgmr.msra.gmra.mxu0 %v244_v9 }
  0xe2   :  { %v233_v11 = vpop.f32.mrf.mxu0 }
  0xe3   :  { %v180_v12 = vadd.f32 %v233_v11, %v204_v10 }
  0xe4   :  { %v141_v13 = vpop.f32.mrf.mxu0 }
  0xe5   :  { %v184_v14 = vmax.f32 %v180_v12, 0.0  ;;  %v178_v15 = vadd.f32 %v204_v10, %v141_v13 }
  0xe6   :  { %v234_v16 = vpop.f32.mrf.mxu0 }
  0xe7   :  { %188 = vst [vmem:[%s313_s3 + $0x10] sm:$0xff] %v184_v14  ;;  %v182_v17 = vmax.f32 %v178_v15, 0.0  ;;  %v181_v18 = vadd.f32 %v234_v16, %v204_v10 }
  0xe8   :  { %v144_v19 = vpop.f32.mrf.mxu0 }
  0xe9   :  { %186 = vst [vmem:[%s313_s3] sm:$0xff] %v182_v17  ;;  %v185_v20 = vmax.f32 %v181_v18, 0.0  ;;  %v179_v21 = vadd.f32 %v204_v10, %v144_v19 }
  0xeb   :  { %189 = vst [vmem:[%s313_s3 + $0x18] sm:$0xff] %v185_v20  ;;  %v183_v22 = vmax.f32 %v179_v21, 0.0 }
  0xed   :  { %187 = vst [vmem:[%s313_s3 + $0x8] sm:$0xff] %v183_v22 }

// kernel: fwd.9
= control target key start
LH: loop header
LB: loop body
LE: loop exit
PB: predicated region body
PF: predicated region fallthrough
CT: control target
= control target key end

     0   :  { %s448_s1 = inlined_call_operand.vmem [shape: bf16[256,128], index: 1, kind: input, shape index: {}]   ;;  %s449_s0 = inlined_call_operand.vmem [shape: bf16[32,256], index: 0, kind: input, shape index: {}]   ;;  %s450_s2 = inlined_call_operand.vmem [shape: f32[1,128], index: 2, kind: input, shape index: {}]   ;;  %s451_s3 = inlined_call_operand.vmem [shape: f32[32,128], index: 3, kind: output, shape index: {}]  }
   0x1   :  { %v331_v0 = vld [vmem:[%s448_s1 + $0x78] sm:$0xff]   ;;  %v333_v2 = vld [vmem:[%s448_s1 + $0x70] sm:$0xff]   ;;  %v335_v4 = vld [vmem:[%s448_s1 + $0x68] sm:$0xff]  }
   0x2   :  { %v332_v1 = vld [vmem:[%s448_s1 + $0x38] sm:$0xff]   ;;  %287 = vmatprep.subr.bf16.mxu0 %v331_v0  ;;  %315 = vmatprep.subr.bf16.mxu1 %v331_v0  ;;  %v334_v3 = vld [vmem:[%s448_s1 + $0x30] sm:$0xff]   ;;  %v336_v5 = vld [vmem:[%s448_s1 + $0x28] sm:$0xff]  }
   0x3   :  { %288 = vmatpush3.bf16.msra.mxu0 %v332_v1  ;;  %323 = vmatpush3.bf16.msra.mxu1 %v332_v1  ;;  %v337_v6 = vld [vmem:[%s448_s1 + $0x60] sm:$0xff]   ;;  %v339_v8 = vld [vmem:[%s448_s1 + $0x58] sm:$0xff]   ;;  %v341_v10 = vld [vmem:[%s448_s1 + $0x50] sm:$0xff]  }
   0x4   :  { %289 = vmatprep.subr.bf16.mxu0 %v333_v2  ;;  %316 = vmatprep.subr.bf16.mxu1 %v333_v2  ;;  %v338_v7 = vld [vmem:[%s448_s1 + $0x20] sm:$0xff]   ;;  %v340_v9 = vld [vmem:[%s448_s1 + $0x18] sm:$0xff]   ;;  %v342_v13 = vld [vmem:[%s448_s1 + $0x10] sm:$0xff]  }
   0x5   :  { %v349_v11 = vld [vmem:[%s449_s0 + $0x4] ss:$8 sps:$4 sm:$0xff]   ;;  %v352_v12 = vld [vmem:[%s449_s0 + $0x14] ss:$8 sps:$4 sm:$0xff]   ;;  %v347_v18 = vld [vmem:[%s449_s0] ss:$8 sps:$4 sm:$0xff]  }
   0x6   :  { %v343_v14 = vld [vmem:[%s448_s1 + $0x48] sm:$0xff]   ;;  %211 = vmatprep.mubr.bf16.mxu0 %v349_v11  ;;  %219 = vmatprep.mubr.bf16.mxu1 %v352_v12  ;;  %v345_v16 = vld [vmem:[%s448_s1 + $0x40] sm:$0xff]   ;;  %v350_v19 = vld [vmem:[%s449_s0 + $0x10] ss:$8 sps:$4 sm:$0xff]  }
   0x7   :  { %290 = vmatpush3.bf16.msra.mxu0 %v334_v3  ;;  %324 = vmatpush3.bf16.msra.mxu1 %v334_v3  ;;  %v344_v15 = vld [vmem:[%s448_s1 + $0x8] sm:$0xff]   ;;  %v346_v17 = vld [vmem:[%s448_s1] sm:$0xff]  }
   0x8   :  { %291 = vmatprep.subr.bf16.mxu0 %v335_v4  ;;  %317 = vmatprep.subr.bf16.mxu1 %v335_v4  ;;  %v286_v23 = vld [vmem:[%s450_s2] ss:$0 sm:$0xff] }
   0xb   :  { %292 = vmatpush3.bf16.msra.mxu0 %v336_v5  ;;  %325 = vmatpush3.bf16.msra.mxu1 %v336_v5 }
   0xc   :  { %293 = vmatprep.subr.bf16.mxu0 %v337_v6  ;;  %318 = vmatprep.subr.bf16.mxu1 %v337_v6 }
   0xf   :  { %294 = vmatpush3.bf16.msra.mxu0 %v338_v7  ;;  %326 = vmatpush3.bf16.msra.mxu1 %v338_v7 }
  0x10   :  { %295 = vmatprep.subr.bf16.mxu0 %v339_v8  ;;  %319 = vmatprep.subr.bf16.mxu1 %v339_v8 }
  0x13   :  { %296 = vmatpush3.bf16.msra.mxu0 %v340_v9  ;;  %327 = vmatpush3.bf16.msra.mxu1 %v340_v9 }
  0x14   :  { %297 = vmatprep.subr.bf16.mxu0 %v341_v10  ;;  %320 = vmatprep.subr.bf16.mxu1 %v341_v10 }
  0x17   :  { %298 = vmatpush3.bf16.msra.mxu0 %v342_v13  ;;  %328 = vmatpush3.bf16.msra.mxu1 %v342_v13 }
  0x18   :  { %299 = vmatprep.subr.bf16.mxu0 %v343_v14  ;;  %321 = vmatprep.subr.bf16.mxu1 %v343_v14 }
  0x1b   :  { %300 = vmatpush3.bf16.msra.mxu0 %v344_v15  ;;  %329 = vmatpush3.bf16.msra.mxu1 %v344_v15 }
  0x1c   :  { %301 = vmatprep.subr.bf16.mxu0 %v345_v16  ;;  %322 = vmatprep.subr.bf16.mxu1 %v345_v16 }
  0x1f   :  { %302 = vmatpush3.bf16.msra.mxu0 %v346_v17  ;;  %330 = vmatpush3.bf16.msra.mxu1 %v346_v17 }
  0x22   :  { %212 = vmatmul.mubr.bf16.vlgmr.msra.gmra.mxu0 %v347_v18  ;;  %220 = vmatmul.mubr.bf16.vlgmr.msra.gmra.mxu1 %v350_v19 }
  0xe2   :  { %v303_v20 = vpop.f32.mrf.mxu0  ;;  %v309_v21 = vpop.f32.mrf.mxu1 }
  0xe4   :  { %v304_v22 = vpop.f32.mrf.mxu0  ;;  %v310_v24 = vpop.f32.mrf.mxu1 }
  0xe5   :  { %v305_v25 = vadd.f32 %v304_v22, %v303_v20  ;;  %v311_v26 = vadd.f32 %v310_v24, %v309_v21 }
  0xe6   :  { %v306_v27 = vpop.f32.mrf.mxu0  ;;  %v312_v28 = vpop.f32.mrf.mxu1 }
  0xe7   :  { %v250_v29 = vadd.f32 %v305_v25, %v286_v23  ;;  %v252_v30 = vadd.f32 %v311_v26, %v286_v23 }
  0xe8   :  { %v307_v31 = vpop.f32.mrf.mxu0  ;;  %v313_v32 = vpop.f32.mrf.mxu1 }
  0xe9   :  { %v254_v33 = vmax.f32 %v250_v29, 0.0  ;;  %v256_v34 = vmax.f32 %v252_v30, 0.0  ;;  %v308_v35 = vadd.f32 %v307_v31, %v306_v27  ;;  %v314_v36 = vadd.f32 %v313_v32, %v312_v28 }
  0xeb   :  { %258 = vst [vmem:[%s451_s3] sm:$0xff] %v254_v33  ;;  %260 = vst [vmem:[%s451_s3 + $0x10] sm:$0xff] %v256_v34  ;;  %v251_v37 = vadd.f32 %v308_v35, %v286_v23  ;;  %v253_v38 = vadd.f32 %v314_v36, %v286_v23 }
  0xed   :  { %v255_v39 = vmax.f32 %v251_v37, 0.0  ;;  %v257_v40 = vmax.f32 %v253_v38, 0.0 }
  0xef   :  { %259 = vst [vmem:[%s451_s3 + $0x8] sm:$0xff] %v255_v39  ;;  %261 = vst [vmem:[%s451_s3 + $0x18] sm:$0xff] %v257_v40 }

// kernel: fwd.10
= control target key start
LH: loop header
LB: loop body
LE: loop exit
PB: predicated region body
PF: predicated region fallthrough
CT: control target
= control target key end

     0   :  { %s373_s1 = inlined_call_operand.vmem [shape: bf16[256,128], index: 1, kind: input, shape index: {}]   ;;  %s374_s0 = inlined_call_operand.vmem [shape: bf16[16,256], index: 0, kind: input, shape index: {}]   ;;  %s375_s2 = inlined_call_operand.vmem [shape: f32[1,128], index: 2, kind: input, shape index: {}]   ;;  %s376_s3 = inlined_call_operand.vmem [shape: f32[16,128], index: 3, kind: output, shape index: {}]  }
   0x1   :  { %v271_v0 = vld [vmem:[%s373_s1 + $0x78] sm:$0xff]   ;;  %v273_v2 = vld [vmem:[%s373_s1 + $0x70] sm:$0xff]   ;;  %v275_v4 = vld [vmem:[%s373_s1 + $0x68] sm:$0xff]  }
   0x2   :  { %v272_v1 = vld [vmem:[%s373_s1 + $0x38] sm:$0xff]   ;;  %249 = vmatprep.subr.bf16.mxu0 %v271_v0  ;;  %v274_v3 = vld [vmem:[%s373_s1 + $0x30] sm:$0xff]   ;;  %v276_v5 = vld [vmem:[%s373_s1 + $0x28] sm:$0xff]  }
   0x3   :  { %250 = vmatpush3.bf16.msra.mxu0 %v272_v1  ;;  %v277_v6 = vld [vmem:[%s373_s1 + $0x60] sm:$0xff]   ;;  %v279_v8 = vld [vmem:[%s373_s1 + $0x58] sm:$0xff]   ;;  %v281_v10 = vld [vmem:[%s373_s1 + $0x50] sm:$0xff]  }
   0x4   :  { %251 = vmatprep.subr.bf16.mxu0 %v273_v2  ;;  %v278_v7 = vld [vmem:[%s373_s1 + $0x20] sm:$0xff]   ;;  %v280_v9 = vld [vmem:[%s373_s1 + $0x18] sm:$0xff]   ;;  %v282_v12 = vld [vmem:[%s373_s1 + $0x10] sm:$0xff]  }
   0x5   :  { %v289_v11 = vld [vmem:[%s374_s0 + $0x4] ss:$8 sps:$4 sm:$0xff]   ;;  %v287_v17 = vld [vmem:[%s374_s0] ss:$8 sps:$4 sm:$0xff]  }
   0x6   :  { %195 = vmatprep.mubr.bf16.mxu0 %v289_v11  ;;  %v283_v13 = vld [vmem:[%s373_s1 + $0x48] sm:$0xff]   ;;  %v285_v15 = vld [vmem:[%s373_s1 + $0x40] sm:$0xff]  }
   0x7   :  { %252 = vmatpush3.bf16.msra.mxu0 %v274_v3  ;;  %v284_v14 = vld [vmem:[%s373_s1 + $0x8] sm:$0xff]   ;;  %v286_v16 = vld [vmem:[%s373_s1] sm:$0xff]  }
   0x8   :  { %253 = vmatprep.subr.bf16.mxu0 %v275_v4  ;;  %v248_v20 = vld [vmem:[%s375_s2] ss:$0 sm:$0xff] }
   0xb   :  { %254 = vmatpush3.bf16.msra.mxu0 %v276_v5 }
   0xc   :  { %255 = vmatprep.subr.bf16.mxu0 %v277_v6 }
   0xf   :  { %256 = vmatpush3.bf16.msra.mxu0 %v278_v7 }
  0x10   :  { %257 = vmatprep.subr.bf16.mxu0 %v279_v8 }
  0x13   :  { %258 = vmatpush3.bf16.msra.mxu0 %v280_v9 }
  0x14   :  { %259 = vmatprep.subr.bf16.mxu0 %v281_v10 }
  0x17   :  { %260 = vmatpush3.bf16.msra.mxu0 %v282_v12 }
  0x18   :  { %261 = vmatprep.subr.bf16.mxu0 %v283_v13 }
  0x1b   :  { %262 = vmatpush3.bf16.msra.mxu0 %v284_v14 }
  0x1c   :  { %263 = vmatprep.subr.bf16.mxu0 %v285_v15 }
  0x1f   :  { %264 = vmatpush3.bf16.msra.mxu0 %v286_v16 }
  0x22   :  { %196 = vmatmul.mubr.bf16.vlgmr.msra.gmra.mxu0 %v287_v17 }
  0xe2   :  { %v265_v18 = vpop.f32.mrf.mxu0 }
  0xe4   :  { %v266_v19 = vpop.f32.mrf.mxu0 }
  0xe5   :  { %v267_v21 = vadd.f32 %v266_v19, %v265_v18 }
  0xe6   :  { %v268_v22 = vpop.f32.mrf.mxu0 }
  0xe7   :  { %v220_v23 = vadd.f32 %v267_v21, %v248_v20 }
  0xe8   :  { %v269_v24 = vpop.f32.mrf.mxu0 }
  0xe9   :  { %v222_v25 = vmax.f32 %v220_v23, 0.0  ;;  %v270_v26 = vadd.f32 %v269_v24, %v268_v22 }
  0xeb   :  { %224 = vst [vmem:[%s376_s3] sm:$0xff] %v222_v25  ;;  %v221_v27 = vadd.f32 %v270_v26, %v248_v20 }
  0xed   :  { %v223_v28 = vmax.f32 %v221_v27, 0.0 }
  0xef   :  { %225 = vst [vmem:[%s376_s3 + $0x8] sm:$0xff] %v223_v28 }

// kernel: fwd.11
= control target key start
LH: loop header
LB: loop body
LE: loop exit
PB: predicated region body
PF: predicated region fallthrough
CT: control target
= control target key end

     0   :  { %s724_s12 = smov 0   ;;  %s726_s13 = smov 0   ;;  %s815_s0 = inlined_call_operand.vmem [shape: bf16[16,384], index: 0, kind: input, shape index: {}]   ;;  %s816_s1 = inlined_call_operand.vmem [shape: bf16[384,128], index: 1, kind: input, shape index: {}]   ;;  %s817_s2 = inlined_call_operand.vmem [shape: f32[1,128], index: 2, kind: input, shape index: {}]   ;;  %s818_s3 = inlined_call_operand.vmem [shape: f32[16,128], index: 3, kind: output, shape index: {}]  }
   0x1   :  { %s728_s14 = smov 0   ;;  %s730_s15 = smov 0  }
   0x2   :  { %s732_s16 = smov 0  }
   0x3 LB: > { %s25_s17 = sadd.s32 1, %s695_s15  ;;  %p48_p1 = scmp.ne.s32.totalorder %s687_s13, %s683_s12  ;;  %s699_s16 = sphi %s732_s16, %s13_s16   ;;  %s695_s15 = sphi %s730_s15, %s822_s15   ;;  %s691_s14 = sphi %s728_s14, %s821_s14   ;;  %s687_s13 = sphi %s726_s13, %s820_s13   ;;  %s683_s12 = sphi %s724_s12, %s819_s12  }
   0x4   : > { %p26_p0 = scmp.ge.s32.totalorder %s25_s17, 3  ;;  %p49_p2 = scmp.eq.s32.totalorder %s699_s16, 0 }
   0x5   : > { %s41_s19 = sadd.s32 1, %s687_s13  ;;  %p557_p5 = scmp.ge.s32.totalorder %s699_s16, 3 }
   0x6   : > { %s824_s17 = smov (%p26_p0, %s25_s17), 0  ;;  %p50_p3 = por %p49_p2, %p48_p1 }
   0x7   : > { %s37_s18 = ssub.s32 %s695_s15, %s824_s17  ;;  %162 = sbr.rel (%p557_p5) target bundleno = 17 (0x11), region = 20 }
   0x8   : > { %p39_p4 = scmp.eq.s32.totalorder %s37_s18, 0 }
   0xa   : > { %s759_s20 = scalar_select %p39_p4, %s687_s13, %s41_s19  }
   0xc   : > { %165 = sbr.rel (!%p50_p3) target bundleno = 17 (0x11), region = 24  ;;  %s167_s21 = sand.u32 (%p50_p3), 1, %s687_s13  }
   0xd   : > { %s559_s22 = sshll.u32 (%p50_p3), %s695_s15, 2  ;;  %s558_s23 = sshll.u32 (%p50_p3), %s167_s21, 3 }
   0xe   : > { %s174_s26 = scalar_lea.vmem (%p50_p3), %s815_s0, %s559_s22  ;;  %s169_s27 = scalar_lea.vmem (%p50_p3), [#allocation3], %s558_s23 }
   0xf   : > { %v191_v0 = vld [vmem:[%s174_s26] sm:$0xf] (%p50_p3)  ;;  %v193_v1 = vld [vmem:[%s174_s26 + $0xc] sm:$0xf] (%p50_p3) }
  0x10   : > { %192 = vst [vmem:[%s169_s27] sm:$0xf] (%p50_p3), %v191_v0  ;;  %194 = vst [vmem:[%s169_s27 + $0x4] sm:$0xf] (%p50_p3), %v193_v1 }
  0x11 PF: > { %p560_p6 = scmp.ge.s32.totalorder %s699_s16, 1  ;;  %p233_p7 = scmp.lt.s32.totalorder %s699_s16, 4 }
  0x13   : > { %p234_p8 = pnand %p560_p6, %p233_p7 }
  0x14   : > { %s240_s28 = sand.u32 (!%p234_p8), 1, %s683_s12   ;;  %s562_s29 = sshll.u32 (!%p234_p8), %s691_s14, 4 }
  0x15   : > { %237 = sbr.rel (%p234_p8) target bundleno = 278 (0x116), region = 69  ;;  %s771_s30 = sshll.u32 (!%p234_p8), %s240_s28, 3 }
  0x16   : > { %p279_p9 = scmp.lt.s32.totalorder (!%p234_p8), %s562_s29, 47  ;;  %s242_s8 = scalar_lea.vmem (!%p234_p8), [#allocation3], %s771_s30 }
  0x17   : > { %p564_p10 = scmp.ne.s32.totalorder (!%p234_p8), %s691_s14, 0 }
  0x1a   : > { %s826_s29 = smov (!%p279_p9, %s562_s29), 47  ;;  %303 = sbr.rel (%p564_p10) target bundleno = 33 (0x21), region = 77 }
  0x1b   : > { %s563_s4 = sshll.u32 %s826_s29, 2 }
  0x1c   : > { %s776_s7 = scalar_lea.vmem %s816_s1, %s563_s4 }
  0x1f   : > { %v701_v2 = vmov 0.0  }
  0x20   : > { %304 = vst [vmem:[#allocation2] sm:$0xff] %v701_v2  ;;  %305 = vst [vmem:[#allocation2 + $0x8] sm:$0xff] %v701_v2 }
  0x21 PF: > { %v652_v3 = vld [vmem:[%s776_s7 + $0x38] sm:$0xff]   ;;  %v702_v4 = vmov 0.0   ;;  %v653_v5 = vld [vmem:[%s776_s7 + $0x30] sm:$0xff]   ;;  %vm703_vm0 = vmmov 0   ;;  %v654_v6 = vld [vmem:[%s776_s7 + $0x28] sm:$0xff]   ;;  %p574_p11 = scmp.ne.s32.totalorder %s691_s14, 2 }
  0x22   : > { %589 = vmatprep.subr.bf16.mxu0 %v702_v4  ;;  %605 = vmatprep.mubr.msk.bf16.mxu0 %vm703_vm0, %v702_v4  ;;  %v655_v7 = vld [vmem:[%s776_s7 + $0x20] sm:$0xff]   ;;  %v656_v8 = vld [vmem:[%s776_s7 + $0x18] sm:$0xff]   ;;  %v657_v9 = vld [vmem:[%s776_s7 + $0x10] sm:$0xff]  }
  0x23   : > { %590 = vmatpush3.bf16.msra.mxu0 %v652_v3  ;;  %v658_v10 = vld [vmem:[%s776_s7 + $0x8] sm:$0xff]   ;;  %v659_v11 = vld [vmem:[%s776_s7] sm:$0xff]   ;;  %v660_v12 = vld [vmem:[%s242_s8] sm:$0xff]  }
  0x24   : > { %591 = vmatprep.subr.bf16.mxu0 %v702_v4 }
  0x27   : > { %592 = vmatpush3.bf16.msra.mxu0 %v653_v5  ;;  %v306_v13 = vld [vmem:[#allocation2] sm:$0xff]  ;;  %v307_v17 = vld [vmem:[#allocation2 + $0x8] sm:$0xff] }
  0x28   : > { %593 = vmatprep.subr.bf16.mxu0 %v702_v4 }
  0x2b   : > { %594 = vmatpush3.bf16.msra.mxu0 %v654_v6 }
  0x2c   : > { %595 = vmatprep.subr.bf16.mxu0 %v702_v4 }
  0x2f   : > { %596 = vmatpush3.bf16.msra.mxu0 %v655_v7 }
  0x30   : > { %597 = vmatprep.subr.bf16.mxu0 %v702_v4 }
  0x33   : > { %598 = vmatpush3.bf16.msra.mxu0 %v656_v8 }
  0x34   : > { %599 = vmatprep.subr.bf16.mxu0 %v702_v4 }
  0x37   : > { %600 = vmatpush3.bf16.msra.mxu0 %v657_v9 }
  0x38   : > { %601 = vmatprep.subr.bf16.mxu0 %v702_v4 }
  0x3b   : > { %602 = vmatpush3.bf16.msra.mxu0 %v658_v10 }
  0x3c   : > { %603 = vmatprep.subr.bf16.mxu0 %v702_v4 }
  0x3f   : > { %604 = vmatpush3.bf16.msra.mxu0 %v659_v11 }
  0x42   : > { %606 = vmatmul.mubr.bf16.vlgmr.msra.gmra.mxu0 %v660_v12 }
 0x102   : > { %v414_v14 = vpop.f32.mrf.mxu0 }
 0x103   : > { %v421_v15 = vadd.f32 %v414_v14, %v306_v13 }
 0x104   : > { %v607_v16 = vpop.f32.mrf.mxu0 }
 0x105   : > { %423 = vst [vmem:[#allocation2] sm:$0xff] %v421_v15  ;;  %428 = sbr.rel (%p574_p11) target bundleno = 278 (0x116), region = 81 }
 0x106   : > { %v417_v18 = vpop.f32.mrf.mxu0 }
 0x107   : > { %v422_v19 = vadd.f32 %v417_v18, %v307_v17 }
 0x108   : > { %v608_v20 = vpop.f32.mrf.mxu0 }
 0x109   : > { %424 = vst [vmem:[#allocation2 + $0x8] sm:$0xff] %v422_v19 }
 0x10a   : > { %v575_v22 = vld [vmem:[%s817_s2] ss:$0 sm:$0xff] }
 0x10c   : > { %v429_v21 = vld [vmem:[#allocation2] sm:$0xff] }
 0x10d   : > { %v438_v24 = vadd.f32 %v575_v22, %v429_v21 }
 0x10f   : > { %v440_v26 = vmax.f32 %v438_v24, 0.0 }
 0x110   : > { %v430_v23 = vld [vmem:[#allocation2 + $0x8] sm:$0xff] }
 0x111   : > { %v439_v25 = vadd.f32 %v575_v22, %v430_v23  ;;  %442 = vst [vmem:[%s818_s3] sm:$0xff] %v440_v26 }
 0x113   : > { %v441_v27 = vmax.f32 %v439_v25, 0.0 }
 0x115   : > { %443 = vst [vmem:[%s818_s3 + $0x8] sm:$0xff] %v441_v27 }
 0x116 PF: > { %s13_s16 = sadd.s32 1, %s699_s16   ;;  %s819_s12 = smov %s687_s13 }
 0x117   : > { %p10_p12 = scmp.ge.s32.totalorder %s13_s16, 5   ;;  %s820_s13 = smov %s759_s20 }
 0x118   : > { %s821_s14 = smov %s695_s15  ;;  %s822_s15 = smov %s824_s17 }
 0x119   :  { %12 = sbr.rel (!%p10_p12) target bundleno = 3 (0x3), region = 122 }

</bundles_post_ra>
